<compile_context>
chip_gen: v5e
topology: v5e:2x2
jax: 0.10.0
libtpu: 0.0.40
codegen_flags: <defaults>
</compile_context>

<pallas_src>
import functools

import jax
import jax.numpy as jnp
from jax.experimental import pallas as pl
from jax.experimental.pallas import tpu as pltpu

_VMEM_LIMIT = 48 * 1024 * 1024  # leave headroom under v7x's 64 MiB physical VMEM


def _round_up(x, m):
    return (x + m - 1) // m * m


def _largest_divisor(n, cands):
    for c in cands:
        if n % c == 0:
            return c
    return cands[-1]


def _pick_node_tiles(n, tm_req=1024, tk_req=2048, max_pad=1.25):
    """Pick power-of-two x 128 node tiles with tm | tk | n_p (no lcm blowup)."""
    n_lane = _round_up(n, 128)

    def pick(req):
        for t in (2048, 1024, 512, 256, 128):
            if t <= req and _round_up(n_lane, t) <= max_pad * n_lane:
                return t
        return 128

    tk = pick(tk_req)            # contraction tile of A_hat (bytes-per-step lever)
    tm = min(pick(tm_req), tk)   # row tile ("parallel" axis)
    n_p = _round_up(n_lane, tk)
    # v7x megacore: prefer an even (>= 2) row-tile count so both TCs stay busy.
    while tm > 128 and (n_p // tm) % 2 == 1:
        tm //= 2
    return tm, tk, n_p


# ---------------------------------------------------------------------------
# Kernel 1: XW = X @ W  (bf16 operands & output, f32 accumulation).
# Runs once per layer -- hoisted out of the aggregation grid.
# ---------------------------------------------------------------------------
def _matmul_bf16_kernel(x_ref, w_ref, out_ref, acc_ref):
    k = pl.program_id(1)

    @pl.when(k == 0)
    def _():
        acc_ref[...] = jnp.zeros_like(acc_ref)

    acc_ref[...] += jnp.dot(x_ref[...], w_ref[...],
                            preferred_element_type=jnp.float32)

    @pl.when(k == pl.num_programs(1) - 1)
    def _():
        out_ref[...] = acc_ref[...].astype(out_ref.dtype)


def _matmul_bf16(x, w, *, tm, tk):
    m, kdim = x.shape
    f_out = w.shape[1]
    grid = (m // tm, kdim // tk)
    return pl.pallas_call(
        _matmul_bf16_kernel,
        out_shape=jax.ShapeDtypeStruct((m, f_out), jnp.bfloat16),
        grid_spec=pltpu.PrefetchScalarGridSpec(
            num_scalar_prefetch=0,
            grid=grid,
            in_specs=[
                pl.BlockSpec((tm, tk), lambda i, k: (i, k)),       # X tile
                pl.BlockSpec((tk, f_out), lambda i, k: (k, 0)),    # W tile
            ],
            out_specs=pl.BlockSpec((tm, f_out), lambda i, k: (i, 0)),
            scratch_shapes=[pltpu.VMEM((tm, f_out), jnp.float32)],
        ),
        compiler_params=pltpu.CompilerParams(
            dimension_semantics=("parallel", "arbitrary"),
            vmem_limit_bytes=_VMEM_LIMIT,
        ),
    )(x, w)


# ---------------------------------------------------------------------------
# Kernel 2: out = finalize(A_hat @ XW + b)  with finalize = relu | log_softmax.
# Grid = (row tiles of A_hat, contraction tiles).  f32 accumulator in VMEM.
# ---------------------------------------------------------------------------
def _aggregate_kernel(a_ref, xw_ref, b_ref, out_ref, acc_ref, *, mode, valid_cols):
    k = pl.program_id(1)

    @pl.when(k == 0)
    def _():
        acc_ref[...] = jnp.zeros_like(acc_ref)

    acc_ref[...] += jnp.dot(a_ref[...], xw_ref[...],
                            preferred_element_type=jnp.float32)

    @pl.when(k == pl.num_programs(1) - 1)
    def _():
        z = acc_ref[...] + b_ref[...]                        # f32 (tm, f_out_pad)
        if mode == "relu":
            out_ref[...] = jnp.maximum(z, 0.0).astype(out_ref.dtype)
        else:
            # Masked log_softmax over the class axis (padded lanes -> -1e30).
            # Output dtype must stay f32 for the -1e30 mask to be safe.
            col = jax.lax.broadcasted_iota(jnp.int32, z.shape, 1)
            zm = jnp.where(col < valid_cols, z, jnp.float32(-1e30))
            m = jnp.max(zm, axis=1, keepdims=True)
            zc = zm - m
            lse = jnp.log(jnp.sum(jnp.exp(zc), axis=1, keepdims=True))
            out_ref[...] = (zc - lse).astype(out_ref.dtype)
            # TODO(synk): chunk this epilogue over sublanes if it shows up as a
            # long tail at very large tm in an xprof trace.


def _aggregate(a, xw, b, *, mode, valid_cols, out_dtype, tm, tk):
    n_p = a.shape[0]
    f_out = xw.shape[1]
    grid = (n_p // tm, n_p // tk)
    kernel = functools.partial(_aggregate_kernel, mode=mode, valid_cols=valid_cols)
    return pl.pallas_call(
        kernel,
        out_shape=jax.ShapeDtypeStruct((n_p, f_out), out_dtype),
        grid_spec=pltpu.PrefetchScalarGridSpec(
            num_scalar_prefetch=0,
            grid=grid,
            in_specs=[
                pl.BlockSpec((tm, tk), lambda i, k: (i, k)),       # A_hat tile
                pl.BlockSpec((tk, f_out), lambda i, k: (k, 0)),    # XW row tile
                pl.BlockSpec((1, f_out), lambda i, k: (0, 0)),     # bias (full)
            ],
            out_specs=pl.BlockSpec((tm, f_out), lambda i, k: (i, 0)),
            scratch_shapes=[pltpu.VMEM((tm, f_out), jnp.float32)],
        ),
        compiler_params=pltpu.CompilerParams(
            dimension_semantics=("parallel", "arbitrary"),
            vmem_limit_bytes=_VMEM_LIMIT,
        ),
    )(a, xw, b)


# ---------------------------------------------------------------------------
# Padding / forward wrappers.
# ---------------------------------------------------------------------------
def pad_gcn_inputs(a_hat, x, w1, b1, w2, b2, *, tm=1024, tk=2048):
    """One-time padding & bf16 casting (hoist out of repeated forward calls).

    Invariant: padded rows/columns of A_hat are exactly zero so padded nodes
    never contribute to real rows (padded rows of H equal relu(b1) but are
    multiplied by zero A_hat columns in layer 2).
    """
    n, fin = x.shape
    hid = w1.shape[1]
    c = w2.shape[1]

    tm_n, tk_n, n_p = _pick_node_tiles(n, tm, tk)
    fin_p = _round_up(fin, 128)
    hid_p = _round_up(hid, 128)
    c_p = _round_up(c, 128)

    f32, bf16 = jnp.float32, jnp.bfloat16
    return dict(
        a=jnp.zeros((n_p, n_p), bf16).at[:n, :n].set(a_hat.astype(bf16)),
        x=jnp.zeros((n_p, fin_p), bf16).at[:n, :fin].set(x.astype(bf16)),
        w1=jnp.zeros((fin_p, hid_p), bf16).at[:fin, :hid].set(w1.astype(bf16)),
        w2=jnp.zeros((hid_p, c_p), bf16).at[:hid, :c].set(w2.astype(bf16)),
        b1=jnp.zeros((1, hid_p), f32).at[:, :hid].set(
            jnp.asarray(b1, f32).reshape(1, -1)),
        b2=jnp.zeros((1, c_p), f32).at[:, :c].set(
            jnp.asarray(b2, f32).reshape(1, -1)),
        n=n, c=c, tm=tm_n, tk=tk_n,
        fin_tile=_largest_divisor(fin_p, (1024, 512, 256, 128)),
        hid_tile=_largest_divisor(hid_p, (1024, 512, 256, 128)),
        xw_row_tile=min(512, tk_n),
    )


def pyg_gcn_forward_padded(p):
    """log_softmax(A @ (relu(A @ (X@W1) + b1) @ W2) + b2) on padded operands."""
    # Layer 1: XW1 once, then tiled aggregation + bias + relu (bf16 out so it
    # feeds layer 2's MXU path directly).
    xw1 = _matmul_bf16(p["x"], p["w1"], tm=p["xw_row_tile"], tk=p["fin_tile"])
    h = _aggregate(p["a"], xw1, p["b1"], mode="relu", valid_cols=0,
                   out_dtype=jnp.bfloat16, tm=p["tm"], tk=p["tk"])
    # Layer 2: HW2 once, then aggregation + bias + masked log_softmax (f32 out).
    hw2 = _matmul_bf16(h, p["w2"], tm=p["xw_row_tile"], tk=p["hid_tile"])
    z = _aggregate(p["a"], hw2, p["b2"], mode="log_softmax", valid_cols=p["c"],
                   out_dtype=jnp.float32, tm=p["tm"], tk=p["tk"])
    return z[:p["n"], :p["c"]]


def pyg_gcn_forward(a_hat, x, w1, b1, w2, b2, *, tm=1024, tk=2048):
    return pyg_gcn_forward_padded(
        pad_gcn_inputs(a_hat, x, w1, b1, w2, b2, tm=tm, tk=tk))


def gcn_normalized_adjacency(edge_index, num_nodes):
    """Dense D^{-1/2} (A + I) D^{-1/2}, matching PyG GCNConv's gcn_norm."""
    src = edge_index[0]
    dst = edge_index[1]
    loop = jnp.arange(num_nodes, dtype=edge_index.dtype)
    src = jnp.concatenate([src, loop])
    dst = jnp.concatenate([dst, loop])
    # A_hat[i, j] != 0 iff edge j -> i (messages flow source -> target).
    a = jnp.zeros((num_nodes, num_nodes), jnp.float32).at[dst, src].add(1.0)
    deg = jnp.sum(a, axis=1)
    dinv = jnp.where(deg > 0, 1.0 / jnp.sqrt(deg), 0.0)
    return dinv[:, None] * a * dinv[None, :]


if __name__ == "__main__":
    # Small synthetic problem: 32 nodes, 16 input feats, 32 hidden, 8 classes.
    N, IN_FEATS, N_HIDDEN, OUT_FEATS = 32, 16, 32, 8

    key = jax.random.PRNGKey(0)
    k_x, k_w1, k_b1, k_w2, k_b2, k_e = jax.random.split(key, 6)

    x = jax.random.normal(k_x, (N, IN_FEATS), dtype=jnp.float32)

    # Deterministic edge set: bidirectional ring + a few random chords.
    ring_src = jnp.arange(N, dtype=jnp.int32)
    ring_dst = (ring_src + 1) % N
    extra_src = jax.random.randint(k_e, (16,), 0, N, dtype=jnp.int32)
    extra_dst = (extra_src + 5) % N
    src = jnp.concatenate([ring_src, ring_dst, extra_src, extra_dst])
    dst = jnp.concatenate([ring_dst, ring_src, extra_dst, extra_src])
    edge_index = jnp.stack([src, dst])            # (2, E), source -> target

    a_hat = gcn_normalized_adjacency(edge_index, N)

    # GCNConv params (W stored as weight.T so the kernel computes x @ W).
    w1 = jax.random.normal(k_w1, (IN_FEATS, N_HIDDEN), dtype=jnp.float32) * 0.1
    b1 = jax.random.normal(k_b1, (1, N_HIDDEN), dtype=jnp.float32) * 0.1
    w2 = jax.random.normal(k_w2, (N_HIDDEN, OUT_FEATS), dtype=jnp.float32) * 0.1
    b2 = jax.random.normal(k_b2, (1, OUT_FEATS), dtype=jnp.float32) * 0.1

    out = pyg_gcn_forward(a_hat, x, w1, b1, w2, b2)
    jax.block_until_ready(out)

    # Pure-JAX f32 reference (same forward semantics as the PyTorch module).
    h_ref = jnp.maximum(a_hat @ (x @ w1) + b1, 0.0)
    z_ref = a_hat @ (h_ref @ w2) + b2
    ref = jax.nn.log_softmax(z_ref, axis=1)

    row_sums = jnp.sum(jnp.exp(out), axis=1)
    assert out.shape == (N, OUT_FEATS)
    assert bool(jnp.all(jnp.abs(row_sums - 1.0) < 1e-4))
    assert bool(jnp.max(jnp.abs(out - ref)) < 5e-2)   # bf16 operands, f32 accumulate

    print("KERNEL_OK")
</pallas_src>

<mosaic_0001>
module attributes {stable_mosaic.version = 11 : i64} {
  func.func @_matmul_bf16_kernel(%arg0: i32, %arg1: i32, %arg2: memref<128x128xbf16, #tpu.memory_space<vmem>>, %arg3: memref<128x128xbf16, #tpu.memory_space<vmem>>, %arg4: memref<128x128xbf16, #tpu.memory_space<vmem>>, %arg5: memref<128x128xf32, #tpu.memory_space<vmem>>) attributes {dimension_semantics = [#tpu.dimension_semantics<parallel>, #tpu.dimension_semantics<arbitrary>], iteration_bounds = array<i64: 1, 1>, scalar_prefetch = 0 : i64, scratch_operands = 1 : i64, tpu.core_type = #tpu.core_type<tc>, window_params = [{transform_indices = @transform_0, window_bounds = array<i64: 128, 128>}, {transform_indices = @transform_1, window_bounds = array<i64: 128, 128>}, {transform_indices = @transform_2, window_bounds = array<i64: 128, 128>}]} {
    %c0_i32 = arith.constant 0 : i32
    %0 = arith.cmpi eq, %arg1, %c0_i32 : i32
    %1 = arith.extui %0 : i1 to i32
    %c0_i32_0 = arith.constant 0 : i32
    %2 = arith.cmpi ne, %1, %c0_i32_0 : i32
    scf.if %2 {
      %cst_10 = arith.constant 0.000000e+00 : f32
      %12 = vector.broadcast %cst_10 : f32 to vector<128x128xf32>
      %c0_11 = arith.constant 0 : index
      %c0_12 = arith.constant 0 : index
      %13 = vector.load %arg5[%c0_11, %c0_12] : memref<128x128xf32, #tpu.memory_space<vmem>>, vector<128x128xf32>
      tpu.vector_store %arg5[%c0_11, %c0_12], %12 {strides = array<i32>} : memref<128x128xf32, #tpu.memory_space<vmem>>, vector<128x128xf32>,
    } else {
    }
    %c0 = arith.constant 0 : index
    %c0_1 = arith.constant 0 : index
    %3 = vector.load %arg5[%c0, %c0_1] : memref<128x128xf32, #tpu.memory_space<vmem>>, vector<128x128xf32>
    %c0_2 = arith.constant 0 : index
    %c0_3 = arith.constant 0 : index
    %4 = vector.load %arg2[%c0_2, %c0_3] : memref<128x128xbf16, #tpu.memory_space<vmem>>, vector<128x128xbf16>
    %c0_4 = arith.constant 0 : index
    %c0_5 = arith.constant 0 : index
    %5 = vector.load %arg3[%c0_4, %c0_5] : memref<128x128xbf16, #tpu.memory_space<vmem>>, vector<128x128xbf16>
    %cst = arith.constant dense<0.000000e+00> : vector<128x128xf32>
    %6 = tpu.matmul %4, %5, %cst {dimension_numbers = #tpu.dot_dimension_numbers<[1], [0], [0], [1], [0, 0, 1, 1], [], []>} : vector<128x128xbf16>, vector<128x128xbf16>, vector<128x128xf32> -> vector<128x128xf32>
    %7 = arith.addf %3, %6 : vector<128x128xf32>
    %c0_6 = arith.constant 0 : index
    %c0_7 = arith.constant 0 : index
    %8 = vector.load %arg5[%c0_6, %c0_7] : memref<128x128xf32, #tpu.memory_space<vmem>>, vector<128x128xf32>
    tpu.vector_store %arg5[%c0_6, %c0_7], %7 {strides = array<i32>} : memref<128x128xf32, #tpu.memory_space<vmem>>, vector<128x128xf32>,
    %c0_i32_8 = arith.constant 0 : i32
    %9 = arith.cmpi eq, %arg1, %c0_i32_8 : i32
    %10 = arith.extui %9 : i1 to i32
    %c0_i32_9 = arith.constant 0 : i32
    %11 = arith.cmpi ne, %10, %c0_i32_9 : i32
    scf.if %11 {
      %c0_10 = arith.constant 0 : index
      %c0_11 = arith.constant 0 : index
      %12 = vector.load %arg5[%c0_10, %c0_11] : memref<128x128xf32, #tpu.memory_space<vmem>>, vector<128x128xf32>
      %13 = arith.truncf %12 : vector<128x128xf32> to vector<128x128xbf16>
      %c0_12 = arith.constant 0 : index
      %c0_13 = arith.constant 0 : index
      %14 = vector.load %arg4[%c0_12, %c0_13] : memref<128x128xbf16, #tpu.memory_space<vmem>>, vector<128x128xbf16>
      tpu.vector_store %arg4[%c0_12, %c0_13], %13 {strides = array<i32>} : memref<128x128xbf16, #tpu.memory_space<vmem>>, vector<128x128xbf16>,
    } else {
    }
    return
  }
  func.func @transform_0(%arg0: i32, %arg1: i32) -> (i32, i32) {
    %c0_i32 = arith.constant 0 : i32
    return %arg0, %arg1 : i32, i32
  }
  func.func @transform_1(%arg0: i32, %arg1: i32) -> (i32, i32) {
    %c0_i32 = arith.constant 0 : i32
    %c0_i32_0 = arith.constant 0 : i32
    return %arg1, %c0_i32 : i32, i32
  }
  func.func @transform_2(%arg0: i32, %arg1: i32) -> (i32, i32) {
    %c0_i32 = arith.constant 0 : i32
    %c0_i32_0 = arith.constant 0 : i32
    return %arg0, %c0_i32 : i32, i32
  }
}

</mosaic_0001>

<bundles_post_ra>
// kernel: tpu_custom_call.1
= control target key start
LH: loop header
LB: loop body
LE: loop exit
PB: predicated region body
PF: predicated region fallthrough
CT: control target
= control target key end

     0   :  { %7 = vsyncpa [#allocation4], 0  ;;  %s632_s0 = inlined_call_operand.hbm [shape: bf16[128,128], index: 0, kind: input, shape index: {}]   ;;  %s633_s1 = inlined_call_operand.hbm [shape: bf16[128,128], index: 1, kind: input, shape index: {}]   ;;  %s634_s2 = inlined_call_operand.hbm [shape: bf16[128,128], index: 2, kind: output, shape index: {}]  }
   0x1   :  { %8 = vsyncpa [#allocation7], 0 }
   0x2   :  { %9 = vsyncpa [#allocation5], 0  ;;  %s14_s11 = sshll.u32 %s632_s0, 4  ;;  %s594_s12 = smov [#allocation3]   ;;  %s15_s11 = int_to_ptr.hbm [resolvable:$true] %s14_s11 }
   0x3   :  { %s16_s13 = sshll.u32 %s594_s12, 4  ;;  %s27_s16 = sshll.u32 %s633_s1, 4  ;;  %s17_s13 = int_to_ptr.vmem [resolvable:$true] %s16_s13  ;;  %s28_s16 = int_to_ptr.hbm [resolvable:$true] %s27_s16 }
   0x4   :  { %s595_s17 = smov 64   ;;  %s596_s18 = smov 4  }
   0x5   :  { %22 = dma.hbm_to_vmem [thread:$0]  %s15_s11, 1024, %s17_s13, [#allocation4], %s595_s17, %s595_s17, %s596_s18  }
   0x6   :  { %s597_s19 = smov [#allocation6]  }
   0x7   :  { %s29_s20 = sshll.u32 %s597_s19, 4  ;;  %s30_s20 = int_to_ptr.vmem [resolvable:$true] %s29_s20 }
   0x8   :  { %35 = dma.hbm_to_vmem [thread:$0]  %s28_s16, 1024, %s30_s20, [#allocation7], %s595_s17, %s595_s17, %s596_s18  }
   0x9   :  { %588 = dma.done.wait [#allocation4], 1024  }
   0xa   :  { %589 = vsyncadd [#allocation4], 4294966272 }
   0xb   :  { %590 = dma.done.wait [#allocation7], 1024  }
   0xc   :  { %591 = vsyncadd [#allocation7], 4294966272  ;;  %v439_v0 = vld [vmem:[#allocation6 + $0x38] sm:$0xff]  ;;  %v438_v1 = vld [vmem:[#allocation6 + $0x30] sm:$0xff]  ;;  %s598_s0 = smov [#allocation8]   ;;  %s346_s23 = sshll.u32 %s634_s2, 4  ;;  %s347_s23 = int_to_ptr.hbm [resolvable:$true] %s346_s23 }
   0xd   :  { %208 = vmatpush.bf16.msra.mxu0 %v439_v0  ;;  %487 = vmatpush.bf16.msra.mxu1 %v439_v0  ;;  %v437_v2 = vld [vmem:[#allocation6 + $0x28] sm:$0xff]  ;;  %v436_v3 = vld [vmem:[#allocation6 + $0x20] sm:$0xff]  ;;  %v435_v4 = vld [vmem:[#allocation6 + $0x18] sm:$0xff]  ;;  %s344_s1 = sshll.u32 %s598_s0, 4  ;;  %s345_s1 = int_to_ptr.vmem [resolvable:$true] %s344_s1 }
   0xe   :  { %488 = vmatpush.bf16.msra.mxu2 %v439_v0  ;;  %489 = vmatpush.bf16.msra.mxu3 %v439_v0  ;;  %v434_v5 = vld [vmem:[#allocation6 + $0x10] sm:$0xff]  ;;  %v433_v6 = vld [vmem:[#allocation6 + $0x8] sm:$0xff]  ;;  %v432_v7 = vld [vmem:[#allocation6] sm:$0xff] }
   0xf   :  { %v424_v8 = vld [vmem:[#allocation3] sm:$0xff]  ;;  %v426_v9 = vld [vmem:[#allocation3 + $0x10] sm:$0xff]  ;;  %v425_v12 = vld [vmem:[#allocation3 + $0x8] sm:$0xff] }
  0x10   :  { %v428_v10 = vld [vmem:[#allocation3 + $0x20] sm:$0xff]  ;;  %v430_v11 = vld [vmem:[#allocation3 + $0x30] sm:$0xff]  ;;  %v427_v13 = vld [vmem:[#allocation3 + $0x18] sm:$0xff] }
  0x11   :  { %209 = vmatpush.bf16.msra.mxu0 %v438_v1  ;;  %490 = vmatpush.bf16.msra.mxu1 %v438_v1  ;;  %v429_v14 = vld [vmem:[#allocation3 + $0x28] sm:$0xff]  ;;  %v431_v15 = vld [vmem:[#allocation3 + $0x38] sm:$0xff] }
  0x12   :  { %491 = vmatpush.bf16.msra.mxu2 %v438_v1  ;;  %492 = vmatpush.bf16.msra.mxu3 %v438_v1 }
  0x15   :  { %210 = vmatpush.bf16.msra.mxu0 %v437_v2  ;;  %493 = vmatpush.bf16.msra.mxu1 %v437_v2 }
  0x16   :  { %494 = vmatpush.bf16.msra.mxu2 %v437_v2  ;;  %495 = vmatpush.bf16.msra.mxu3 %v437_v2 }
  0x19   :  { %211 = vmatpush.bf16.msra.mxu0 %v436_v3  ;;  %496 = vmatpush.bf16.msra.mxu1 %v436_v3 }
  0x1a   :  { %497 = vmatpush.bf16.msra.mxu2 %v436_v3  ;;  %498 = vmatpush.bf16.msra.mxu3 %v436_v3 }
  0x1d   :  { %212 = vmatpush.bf16.msra.mxu0 %v435_v4  ;;  %499 = vmatpush.bf16.msra.mxu1 %v435_v4 }
  0x1e   :  { %500 = vmatpush.bf16.msra.mxu2 %v435_v4  ;;  %501 = vmatpush.bf16.msra.mxu3 %v435_v4 }
  0x21   :  { %213 = vmatpush.bf16.msra.mxu0 %v434_v5  ;;  %502 = vmatpush.bf16.msra.mxu1 %v434_v5 }
  0x22   :  { %503 = vmatpush.bf16.msra.mxu2 %v434_v5  ;;  %504 = vmatpush.bf16.msra.mxu3 %v434_v5 }
  0x25   :  { %214 = vmatpush.bf16.msra.mxu0 %v433_v6  ;;  %505 = vmatpush.bf16.msra.mxu1 %v433_v6 }
  0x26   :  { %506 = vmatpush.bf16.msra.mxu2 %v433_v6  ;;  %507 = vmatpush.bf16.msra.mxu3 %v433_v6 }
  0x29   :  { %215 = vmatpush.bf16.msra.mxu0 %v432_v7  ;;  %508 = vmatpush.bf16.msra.mxu1 %v432_v7 }
  0x2a   :  { %509 = vmatpush.bf16.msra.mxu2 %v432_v7  ;;  %510 = vmatpush.bf16.msra.mxu3 %v432_v7 }
  0x2c   :  { %216 = vmatmul.bf16.vlgmr.msra.gmra.mxu0 %v424_v8  ;;  %226 = vmatmul.bf16.vlgmr.msra.gmra.mxu1 %v426_v9 }
  0x2d   :  { %236 = vmatmul.bf16.vlgmr.msra.gmra.mxu2 %v428_v10  ;;  %246 = vmatmul.bf16.vlgmr.msra.gmra.mxu3 %v430_v11 }
  0x3c   :  { %221 = vmatmul.bf16.gmra.mxu0 %v425_v12  ;;  %231 = vmatmul.bf16.gmra.mxu1 %v427_v13 }
  0x3d   :  { %241 = vmatmul.bf16.gmra.mxu2 %v429_v14  ;;  %251 = vmatmul.bf16.gmra.mxu3 %v431_v15 }
  0xa9   :  { %v217_v16 = vpop.f32.mrf.mxu0  ;;  %v227_v17 = vpop.f32.mrf.mxu1 }
  0xb0   :  { %v237_v18 = vpop.f32.mrf.mxu2  ;;  %v247_v19 = vpop.f32.mrf.mxu3 }
  0xb1   :  { %v219_v20 = vpop.f32.mrf.mxu0  ;;  %v229_v21 = vpop.f32.mrf.mxu1 }
  0xb2   :  { %v443_v22 = vpack.c.bf16 %v219_v20, %v217_v16  ;;  %v453_v23 = vpack.c.bf16 %v229_v21, %v227_v17 }
  0xb4   :  { %444 = vst [vmem:[#allocation8] sm:$0xff] %v443_v22  }
  0xb5   :  { %481 = vst [vmem:[#allocation8 + $0x10] sm:$0xff] %v453_v23  }
  0xb8   :  { %v239_v24 = vpop.f32.mrf.mxu2  ;;  %v249_v25 = vpop.f32.mrf.mxu3 }
  0xb9   :  { %v463_v26 = vpack.c.bf16 %v239_v24, %v237_v18  ;;  %v473_v27 = vpack.c.bf16 %v249_v25, %v247_v19  ;;  %v222_v28 = vpop.f32.mrf.mxu0  ;;  %v232_v29 = vpop.f32.mrf.mxu1 }
  0xbb   :  { %483 = vst [vmem:[#allocation8 + $0x20] sm:$0xff] %v463_v26  }
  0xbc   :  { %485 = vst [vmem:[#allocation8 + $0x30] sm:$0xff] %v473_v27  }
  0xc0   :  { %v242_v30 = vpop.f32.mrf.mxu2  ;;  %v252_v31 = vpop.f32.mrf.mxu3 }
  0xc1   :  { %v224_v32 = vpop.f32.mrf.mxu0  ;;  %v234_v33 = vpop.f32.mrf.mxu1 }
  0xc2   :  { %v448_v34 = vpack.c.bf16 %v224_v32, %v222_v28  ;;  %v458_v35 = vpack.c.bf16 %v234_v33, %v232_v29 }
  0xc4   :  { %480 = vst [vmem:[#allocation8 + $0x8] sm:$0xff] %v448_v34  }
  0xc5   :  { %482 = vst [vmem:[#allocation8 + $0x18] sm:$0xff] %v458_v35  }
  0xc8   :  { %v244_v36 = vpop.f32.mrf.mxu2  ;;  %v254_v37 = vpop.f32.mrf.mxu3 }
  0xc9   :  { %v468_v38 = vpack.c.bf16 %v244_v36, %v242_v30  ;;  %v478_v39 = vpack.c.bf16 %v254_v37, %v252_v31 }
  0xcb   :  { %484 = vst [vmem:[#allocation8 + $0x28] sm:$0xff] %v468_v38  }
  0xcc   :  { %486 = vst [vmem:[#allocation8 + $0x38] sm:$0xff] %v478_v39  }
  0xcd   :  { %352 = dma.vmem_to_hbm [thread:$0]  %s345_s1, 1024, %s347_s23, [#allocation5], %s595_s17, %s595_s17, %s596_s18  }
  0xce   :  { %592 = dma.done.wait [#allocation5], 1024  }
  0xcf   :  { %593 = vsyncadd [#allocation5], 4294966272 }
  0xd0   :  { %357 = vsyncpa [#allocation4], 1 }
  0xd1   :  { %358 = vsyncpa [#allocation7], 1 }
  0xd2   :  { %359 = vsyncpa [#allocation5], 1 }

</bundles_post_ra>
